<compile_context>
chip_gen: v6e
topology: v6e:2x2x1
jax: 0.10.0
libtpu: 0.0.40
codegen_flags: <defaults>
</compile_context>

<pallas_src>
import jax
import jax.numpy as jnp
from jax.experimental import pallas as pl
from jax.experimental.pallas import tpu as pltpu

N = 4                  # number of input features (BatchNorm1d(N))
NUM_CLASSES = N + 1    # Linear output dim
BN_EPS = 1e-5


def _bn_stats_kernel(xt_ref, sum_ref, sq_ref):
    """Pass 1: accumulate per-feature sum and sum-of-squares over batch tiles.

    xt_ref : (F, TB) float32   x transposed, batch on the lane axis
    sum_ref: (F, 1)  float32   resident accumulator (same block for every grid step)
    sq_ref : (F, 1)  float32   resident accumulator
    """
    @pl.when(pl.program_id(0) == 0)
    def _():
        sum_ref[...] = jnp.zeros_like(sum_ref)
        sq_ref[...] = jnp.zeros_like(sq_ref)

    x = xt_ref[...]                                          # (F, TB)
    sum_ref[...] += jnp.sum(x, axis=1, keepdims=True)        # XLU cross-lane reduce
    sq_ref[...] += jnp.sum(x * x, axis=1, keepdims=True)


def _bn_linear_softmax_kernel(xt_ref, w_ref, b_ref, out_ref):
    """Pass 2: (BN-folded) linear + softmax, fully lane-dense.

    xt_ref : (F, TB) float32   x transposed (raw input; BN folded into w/b)
    w_ref  : (C, F)  float32   W * (gamma * inv_std)
    b_ref  : (C, 1)  float32   b + W @ (beta - mean * gamma * inv_std)
    out_ref: (C, TB) float32   softmax probabilities, transposed
    """
    xt = xt_ref[...]                                         # (F, TB)
    w = w_ref[...]                                           # (C, F)

    # K=4 contraction as unrolled VPU broadcast-FMAs; bias fused into the first term.
    logits = b_ref[...] + w[:, 0:1] * xt[0:1, :]             # (C, TB)
    for f in range(1, xt_ref.shape[0]):
        logits = logits + w[:, f:f+1] * xt[f:f+1, :]

    # Softmax over the class axis (C=5 sublanes); batch stays on the lane axis.
    m = jnp.max(logits, axis=0, keepdims=True)               # (1, TB)
    e = jnp.exp(logits - m)                                  # EUP
    denom = jnp.sum(e, axis=0, keepdims=True)                # (1, TB)
    out_ref[...] = e * pl.reciprocal(denom, approx=True)     # EUP vrcp


def multi_classification_forward(x, gamma, beta, w, b, *, block_b=16384):
    """Forward pass of MultiClassficationModel (y=None path).

    x     : (B, F) float32
    gamma : (F,)   BatchNorm1d weight
    beta  : (F,)   BatchNorm1d bias
    w     : (C, F) Linear weight (PyTorch layout)
    b     : (C,)   Linear bias
    returns (B, C) softmax probabilities.
    """
    B, F = x.shape
    C = w.shape[0]

    # ---- lane-dense layout: batch on the 128-lane axis, zero-padded to a tile multiple.
    # (Zero padding is stats-safe: padded columns contribute 0 to sum and sum-of-squares;
    #  we divide by the real B below.  Padded output columns are sliced off.)
    b_min = pl.cdiv(B, 128) * 128
    tb = max(128, (min(block_b, b_min) // 128) * 128)        # tile width, multiple of 128
    b_pad = pl.cdiv(B, tb) * tb
    num_tiles = b_pad // tb

    xt = jnp.pad(x.astype(jnp.float32).T, ((0, 0), (0, b_pad - B)))   # (F, b_pad)

    # ---- pass 1: batch statistics (reduction over batch tiles -> "arbitrary") ----
    sums, sumsq = pl.pallas_call(
        _bn_stats_kernel,
        out_shape=(jax.ShapeDtypeStruct((F, 1), jnp.float32),
                   jax.ShapeDtypeStruct((F, 1), jnp.float32)),
        grid=(num_tiles,),
        in_specs=[pl.BlockSpec((F, tb), lambda i: (0, i))],
        out_specs=(pl.BlockSpec((F, 1), lambda i: (0, 0)),
                   pl.BlockSpec((F, 1), lambda i: (0, 0))),
        compiler_params=pltpu.CompilerParams(
            dimension_semantics=("arbitrary",)),
    )(xt)

    # ---- fold BN (train-mode, biased variance) into the linear layer (tiny jnp math) ----
    n = jnp.float32(B)
    mean = sums[:, 0] / n                                    # (F,)
    var = jnp.maximum(sumsq[:, 0] / n - mean * mean, 0.0)    # biased batch variance
    scale = gamma.astype(jnp.float32) * jax.lax.rsqrt(var + BN_EPS)          # gamma/std
    w_eff = (w.astype(jnp.float32) * scale[None, :])                         # (C, F)
    b_eff = (b.astype(jnp.float32)
             + w.astype(jnp.float32) @ (beta.astype(jnp.float32) - mean * scale))
    b_eff = b_eff.reshape(C, 1)

    # ---- pass 2: folded linear + softmax, independent per batch tile -> "parallel" ----
    probs_t = pl.pallas_call(
        _bn_linear_softmax_kernel,
        out_shape=jax.ShapeDtypeStruct((C, b_pad), jnp.float32),
        grid=(num_tiles,),
        in_specs=[
            pl.BlockSpec((F, tb), lambda i: (0, i)),
            pl.BlockSpec((C, F), lambda i: (0, 0)),
            pl.BlockSpec((C, 1), lambda i: (0, 0)),
        ],
        out_specs=pl.BlockSpec((C, tb), lambda i: (0, i)),
        compiler_params=pltpu.CompilerParams(
            dimension_semantics=("parallel",)),
    )(xt, w_eff, b_eff)

    return probs_t[:, :B].T                                  # back to PyTorch (B, C) layout


if __name__ == "__main__":
    key = jax.random.PRNGKey(0)
    k_x, k_w, k_b, k_g, k_be = jax.random.split(key, 5)

    B = 8
    input_size = N   # BatchNorm1d(N) followed by Linear(input_size, N+1) => input_size == N

    x = jax.random.normal(k_x, (B, input_size), dtype=jnp.float32)

    # BatchNorm1d affine params (PyTorch inits weight=1, bias=0; perturb slightly so the
    # affine / folding path is actually exercised).
    gamma = 1.0 + 0.1 * jax.random.normal(k_g, (input_size,), dtype=jnp.float32)
    beta = 0.1 * jax.random.normal(k_be, (input_size,), dtype=jnp.float32)

    # Linear params, deterministic random init in PyTorch (C, F) layout.
    bound = 1.0 / (input_size ** 0.5)
    w = jax.random.uniform(k_w, (NUM_CLASSES, input_size),
                           minval=-bound, maxval=bound, dtype=jnp.float32)
    b = jax.random.uniform(k_b, (NUM_CLASSES,),
                           minval=-bound, maxval=bound, dtype=jnp.float32)

    probs = multi_classification_forward(x, gamma, beta, w, b)
    probs = jax.block_until_ready(probs)

    # Pure-JAX reference of the original (unfolded) module math.
    mean = jnp.mean(x, axis=0, keepdims=True)
    var = jnp.mean((x - mean) ** 2, axis=0, keepdims=True)
    x_bn = (x - mean) / jnp.sqrt(var + BN_EPS) * gamma + beta
    logits = x_bn @ w.T + b
    ref = jax.nn.softmax(logits, axis=1)

    assert probs.shape == (B, NUM_CLASSES)
    # Tolerance is slightly looser than machine-eps because of (a) the approx EUP
    # reciprocal in the softmax and (b) the one-pass variance + BN->Linear fold.
    assert jnp.allclose(probs, ref, atol=2e-4, rtol=5e-3), \
        float(jnp.max(jnp.abs(probs - ref)))
    print("KERNEL_OK")
</pallas_src>

<mosaic_0001>
module attributes {stable_mosaic.version = 11 : i64} {
  func.func @_bn_stats_kernel(%arg0: i32, %arg1: memref<4x128xf32, #tpu.memory_space<vmem>>, %arg2: memref<4x1xf32, #tpu.memory_space<vmem>>, %arg3: memref<4x1xf32, #tpu.memory_space<vmem>>) attributes {dimension_semantics = [#tpu.dimension_semantics<arbitrary>], iteration_bounds = array<i64: 1>, scalar_prefetch = 0 : i64, scratch_operands = 0 : i64, tpu.core_type = #tpu.core_type<tc>, window_params = [{transform_indices = @transform_0, window_bounds = array<i64: 4, 128>}, {pipeline_mode = #tpu.pipeline_mode<synchronous>, transform_indices = @transform_1, window_bounds = array<i64: 4, 1>}, {pipeline_mode = #tpu.pipeline_mode<synchronous>, transform_indices = @transform_2, window_bounds = array<i64: 4, 1>}]} {
    %c0_i32 = arith.constant 0 : i32
    %0 = arith.cmpi eq, %arg0, %c0_i32 : i32
    %1 = arith.extui %0 : i1 to i32
    %c0_i32_0 = arith.constant 0 : i32
    %2 = arith.cmpi ne, %1, %c0_i32_0 : i32
    scf.if %2 {
      %cst_11 = arith.constant 0.000000e+00 : f32
      %15 = vector.broadcast %cst_11 : f32 to vector<4x1xf32>
      %c0_12 = arith.constant 0 : index
      %c0_13 = arith.constant 0 : index
      %16 = vector.load %arg2[%c0_12, %c0_13] : memref<4x1xf32, #tpu.memory_space<vmem>>, vector<4x1xf32>
      tpu.vector_store %arg2[%c0_12, %c0_13], %15 {strides = array<i32>} : memref<4x1xf32, #tpu.memory_space<vmem>>, vector<4x1xf32>,
      %cst_14 = arith.constant 0.000000e+00 : f32
      %17 = vector.broadcast %cst_14 : f32 to vector<4x1xf32>
      %c0_15 = arith.constant 0 : index
      %c0_16 = arith.constant 0 : index
      %18 = vector.load %arg3[%c0_15, %c0_16] : memref<4x1xf32, #tpu.memory_space<vmem>>, vector<4x1xf32>
      tpu.vector_store %arg3[%c0_15, %c0_16], %17 {strides = array<i32>} : memref<4x1xf32, #tpu.memory_space<vmem>>, vector<4x1xf32>,
    } else {
    }
    %c0 = arith.constant 0 : index
    %c0_1 = arith.constant 0 : index
    %3 = vector.load %arg1[%c0, %c0_1] : memref<4x128xf32, #tpu.memory_space<vmem>>, vector<4x128xf32>
    %c0_2 = arith.constant 0 : index
    %c0_3 = arith.constant 0 : index
    %4 = vector.load %arg2[%c0_2, %c0_3] : memref<4x1xf32, #tpu.memory_space<vmem>>, vector<4x1xf32>
    %cst = arith.constant dense<0.000000e+00> : vector<4xf32>
    %5 = vector.multi_reduction <add>, %3, %cst [1] : vector<4x128xf32> to vector<4xf32>
    %6 = vector.shape_cast %5 : vector<4xf32> to vector<4x1xf32>
    %7 = arith.addf %4, %6 : vector<4x1xf32>
    %c0_4 = arith.constant 0 : index
    %c0_5 = arith.constant 0 : index
    %8 = vector.load %arg2[%c0_4, %c0_5] : memref<4x1xf32, #tpu.memory_space<vmem>>, vector<4x1xf32>
    tpu.vector_store %arg2[%c0_4, %c0_5], %7 {strides = array<i32>} : memref<4x1xf32, #tpu.memory_space<vmem>>, vector<4x1xf32>,
    %c0_6 = arith.constant 0 : index
    %c0_7 = arith.constant 0 : index
    %9 = vector.load %arg3[%c0_6, %c0_7] : memref<4x1xf32, #tpu.memory_space<vmem>>, vector<4x1xf32>
    %10 = arith.mulf %3, %3 : vector<4x128xf32>
    %cst_8 = arith.constant dense<0.000000e+00> : vector<4xf32>
    %11 = vector.multi_reduction <add>, %10, %cst_8 [1] : vector<4x128xf32> to vector<4xf32>
    %12 = vector.shape_cast %11 : vector<4xf32> to vector<4x1xf32>
    %13 = arith.addf %9, %12 : vector<4x1xf32>
    %c0_9 = arith.constant 0 : index
    %c0_10 = arith.constant 0 : index
    %14 = vector.load %arg3[%c0_9, %c0_10] : memref<4x1xf32, #tpu.memory_space<vmem>>, vector<4x1xf32>
    tpu.vector_store %arg3[%c0_9, %c0_10], %13 {strides = array<i32>} : memref<4x1xf32, #tpu.memory_space<vmem>>, vector<4x1xf32>,
    return
  }
  func.func @transform_0(%arg0: i32) -> (i32, i32) {
    %c0_i32 = arith.constant 0 : i32
    %c0_i32_0 = arith.constant 0 : i32
    return %c0_i32, %arg0 : i32, i32
  }
  func.func @transform_1(%arg0: i32) -> (i32, i32) {
    %c0_i32 = arith.constant 0 : i32
    %c0_i32_0 = arith.constant 0 : i32
    %c0_i32_1 = arith.constant 0 : i32
    return %c0_i32, %c0_i32_0 : i32, i32
  }
  func.func @transform_2(%arg0: i32) -> (i32, i32) {
    %c0_i32 = arith.constant 0 : i32
    %c0_i32_0 = arith.constant 0 : i32
    %c0_i32_1 = arith.constant 0 : i32
    return %c0_i32, %c0_i32_0 : i32, i32
  }
}

</mosaic_0001>

<bundles_post_ra>
// kernel: tpu_custom_call.1
= control target key start
LH: loop header
LB: loop body
LE: loop exit
PB: predicated region body
PF: predicated region fallthrough
CT: control target
= control target key end

     0   :  { %8 = vsyncpa [#allocation3], 0  ;;  %s78_s9 = smov [#allocation2]   ;;  %s120_s0 = inlined_call_operand.hbm [shape: f32[4,128], index: 0, kind: input, shape index: {}]   ;;  %s121_s1 = inlined_call_operand.vmem [shape: f32[4,1], index: 1, kind: output, shape index: {0}]   ;;  %s122_s2 = inlined_call_operand.vmem [shape: f32[4,1], index: 2, kind: output, shape index: {1}]  }
   0x1   :  { %s15_s10 = sshll.u32 %s78_s9, 4  ;;  %s16_s10 = int_to_ptr.vmem [resolvable:$true] %s15_s10 }
   0x2   :  { %s64_s11 = scalar_lea.vmem %s16_s10, 64  ;;  %p69_p1 = scmp.lt.s32.totalorder %s16_s10, %s16_s10 }
   0x3   :  { %p65_p0 = scmp.ne.s32.totalorder %s16_s10, %s64_s11  ;;  %p70_p2 = scmp.lt.s32.totalorder %s64_s11, %s64_s11 }
   0x5   :  { %p71_p3 = por %p70_p2, %p69_p1 }
   0x7   :  { %p72_p4 = pnand %p71_p3, %p65_p0 }
   0x9   :  { %75 = shalt.err (!%p72_p4)
}
   0xa   :  { %18 = dma.hbm_to_vmem [thread:$0]  %s120_s0, 64, %s16_s10, [#allocation3]  }
   0xb   :  { %76 = dma.done.wait [#allocation3], 64  }
   0xc   :  { %77 = vsyncadd [#allocation3], 4294967232  ;;  %vm26_vm0 = vcmask 3072   ;;  %v79_v0 = vmov 0.0   ;;  %vm31_vm1 = vcmask 1043456  }
   0xd   :  { %27 = vst.msk [vmem:[%s121_s1] sm:$0xf] %vm26_vm0, %v79_v0  ;;  %28 = vst.msk [vmem:[%s122_s2] sm:$0xf] %vm26_vm0, %v79_v0  ;;  %v29_v1 = vld [vmem:[#allocation2] sm:$0xf] }
   0xe   :  { %v32_v2 = vsel %vm31_vm1, %v29_v1, 0.0  ;;  %v39_v3 = vmul.f32 %v29_v1, %v29_v1 }
   0xf   :  { %33 = vadd.xlane.f32.xlu0 %v32_v2 }
  0x10   :  { %v40_v4 = vsel %vm31_vm1, %v39_v3, 0.0 }
  0x13   :  { %41 = vadd.xlane.f32.xlu0 %v40_v4 }
  0x14   :  { %v30_v5 = vld [vmem:[%s121_s1] sm:$0xf] }
  0x15   :  { %v38_v8 = vld [vmem:[%s122_s2] sm:$0xf] }
  0x98   :  { %v34_v6 = vpop.xlane.xlu0 %33 }
  0x99   :  { %v35_v7 = vadd.f32 %v34_v6, %v30_v5 }
  0x9b   :  { %37 = vst.msk [vmem:[%s121_s1] sm:$0xf] %vm26_vm0, %v35_v7 }
  0x9c   :  { %v42_v9 = vpop.xlane.xlu0 %41 }
  0x9d   :  { %v43_v10 = vadd.f32 %v42_v9, %v38_v8 }
  0x9f   :  { %44 = vst.msk [vmem:[%s122_s2] sm:$0xf] %vm26_vm0, %v43_v10 }
  0xa0   :  { %53 = vsyncpa [#allocation3], 1 }

</bundles_post_ra>
